<compile_context>
chip_gen: v7x
topology: tpu7x:2x2x1
jax: 0.10.0
libtpu: 0.0.40
codegen_flags: <defaults>
</compile_context>

<pallas_src>
import functools

import jax
import jax.numpy as jnp
from jax.experimental import pallas as pl
from jax.experimental.pallas import tpu as pltpu

LANE = 128      # lane width (last dim granularity)
SUBLANE = 8     # sublane width (second-to-last dim granularity, f32)
MAX_BATCH_TILE = 256  # rows per grid step for large (replay-buffer) batches


def _round_up(n, m):
    return ((n + m - 1) // m) * m


def actor_kernel(x_ref, w1_ref, w2_ref, w3_ref, o_ref):
    # x: (TB, Sp)  w1: (Sp, H1p)  w2: (H1p, H2p)  w3: (H2p, Ap)  o: (TB, Ap)
    x = x_ref[...]
    h1 = jnp.dot(x, w1_ref[...], preferred_element_type=jnp.float32)
    h1 = jnp.maximum(h1, 0.0)
    h2 = jnp.dot(h1, w2_ref[...], preferred_element_type=jnp.float32)
    h2 = jnp.maximum(h2, 0.0)
    h3 = jnp.dot(h2, w3_ref[...], preferred_element_type=jnp.float32)
    o_ref[...] = jnp.tanh(h3).astype(o_ref.dtype)


def init_actor_params(key, state_dim, action_dim, hidden_one, hidden_two):
    """PyTorch-layout (out, in) weights, U(-0.003, 0.003) like weights_init_uniform."""
    k1, k2, k3 = jax.random.split(key, 3)
    w1 = jax.random.uniform(k1, (hidden_one, state_dim), jnp.float32, -0.003, 0.003)
    w2 = jax.random.uniform(k2, (hidden_two, hidden_one), jnp.float32, -0.003, 0.003)
    w3 = jax.random.uniform(k3, (action_dim, hidden_two), jnp.float32, -0.003, 0.003)
    return w1, w2, w3


def prepare_actor_params(w1, w2, w3):
    """One-time prep (NOT per call): transpose to (in, out) and zero-pad every
    feature dim up to a multiple of 128 lanes."""
    def pad2d(a, rows, cols):
        out = jnp.zeros((rows, cols), a.dtype)
        return out.at[: a.shape[0], : a.shape[1]].set(a)

    h1, s = w1.shape
    h2 = w2.shape[0]
    a = w3.shape[0]
    sp, h1p = _round_up(s, LANE), _round_up(h1, LANE)
    h2p, ap = _round_up(h2, LANE), _round_up(a, LANE)
    w1p = pad2d(w1.T, sp, h1p)    # (Sp, H1p)
    w2p = pad2d(w2.T, h1p, h2p)   # (H1p, H2p)
    w3p = pad2d(w3.T, h2p, ap)    # (H2p, Ap)
    return w1p, w2p, w3p


@functools.partial(jax.jit, static_argnames=("state_dim", "action_dim"))
def actor_forward(state, w1p, w2p, w3p, *, state_dim, action_dim):
    """state: (B, state_dim) f32; w*p: lane-padded (in, out) weights from
    prepare_actor_params. Returns (B, action_dim)."""
    B = state.shape[0]
    Sp, H1p = w1p.shape
    H2p, Ap = w3p.shape

    # Batch tile: multiple of 8 sublanes, capped at MAX_BATCH_TILE rows.
    TB = min(MAX_BATCH_TILE, _round_up(B, SUBLANE))
    Bp = _round_up(B, TB)
    grid = (pl.cdiv(Bp, TB),)

    # Zero-pad the activation slab once per call (rows to Bp, lanes to Sp).
    x = jnp.zeros((Bp, Sp), state.dtype).at[:B, :state_dim].set(state)

    out = pl.pallas_call(
        actor_kernel,
        out_shape=jax.ShapeDtypeStruct((Bp, Ap), state.dtype),
        grid=grid,
        in_specs=[
            pl.BlockSpec((TB, Sp), lambda i: (i, 0)),     # batch-tiled activations
            pl.BlockSpec((Sp, H1p), lambda i: (0, 0)),    # weights stay VMEM-resident
            pl.BlockSpec((H1p, H2p), lambda i: (0, 0)),
            pl.BlockSpec((H2p, Ap), lambda i: (0, 0)),
        ],
        out_specs=pl.BlockSpec((TB, Ap), lambda i: (i, 0)),
        compiler_params=pltpu.CompilerParams(
            dimension_semantics=("parallel",),   # shard batch tiles across TCs on v7x
        ),
    )(x, w1p, w2p, w3p)

    return out[:B, :action_dim]


if __name__ == "__main__":
    state_dim, action_dim = 16, 8
    hidden_one, hidden_two = 32, 32
    batch = 8

    key = jax.random.PRNGKey(0)
    k_params, k_state = jax.random.split(key)
    w1, w2, w3 = init_actor_params(k_params, state_dim, action_dim,
                                   hidden_one, hidden_two)
    state = jax.random.normal(k_state, (batch, state_dim), jnp.float32)

    # One-time layout prep (transpose + lane padding), outside the hot path.
    w1p, w2p, w3p = prepare_actor_params(w1, w2, w3)
    w1p, w2p, w3p = jax.block_until_ready((w1p, w2p, w3p))

    out = actor_forward(state, w1p, w2p, w3p,
                        state_dim=state_dim, action_dim=action_dim)
    out = jax.block_until_ready(out)

    # Reference check in plain JAX (same math as the PyTorch module).
    ref = jnp.tanh(
        jnp.maximum(jnp.maximum(state @ w1.T, 0.0) @ w2.T, 0.0) @ w3.T
    )
    assert out.shape == (batch, action_dim)
    assert jnp.allclose(out, ref, atol=1e-6, rtol=1e-5)

    # Also exercise a replay-buffer-sized batch (multi-tile grid path).
    big_state = jax.random.normal(jax.random.PRNGKey(1), (1000, state_dim), jnp.float32)
    big_out = jax.block_until_ready(
        actor_forward(big_state, w1p, w2p, w3p,
                      state_dim=state_dim, action_dim=action_dim))
    big_ref = jnp.tanh(
        jnp.maximum(jnp.maximum(big_state @ w1.T, 0.0) @ w2.T, 0.0) @ w3.T
    )
    assert big_out.shape == (1000, action_dim)
    assert jnp.allclose(big_out, big_ref, atol=1e-6, rtol=1e-5)

    print("KERNEL_OK")
</pallas_src>

<mosaic_0001>
module attributes {stable_mosaic.version = 11 : i64} {
  func.func @actor_kernel(%arg0: i32, %arg1: memref<8x128xf32, #tpu.memory_space<vmem>>, %arg2: memref<128x128xf32, #tpu.memory_space<vmem>>, %arg3: memref<128x128xf32, #tpu.memory_space<vmem>>, %arg4: memref<128x128xf32, #tpu.memory_space<vmem>>, %arg5: memref<8x128xf32, #tpu.memory_space<vmem>>) attributes {dimension_semantics = [#tpu.dimension_semantics<parallel>], iteration_bounds = array<i64: 1>, scalar_prefetch = 0 : i64, scratch_operands = 0 : i64, tpu.core_type = #tpu.core_type<tc>, window_params = [{transform_indices = @transform_0, window_bounds = array<i64: 8, 128>}, {pipeline_mode = #tpu.pipeline_mode<synchronous>, transform_indices = @transform_1, window_bounds = array<i64: 128, 128>}, {pipeline_mode = #tpu.pipeline_mode<synchronous>, transform_indices = @transform_2, window_bounds = array<i64: 128, 128>}, {pipeline_mode = #tpu.pipeline_mode<synchronous>, transform_indices = @transform_3, window_bounds = array<i64: 128, 128>}, {transform_indices = @transform_4, window_bounds = array<i64: 8, 128>}]} {
    %c0 = arith.constant 0 : index
    %c0_0 = arith.constant 0 : index
    %0 = vector.load %arg1[%c0, %c0_0] : memref<8x128xf32, #tpu.memory_space<vmem>>, vector<8x128xf32>
    %c0_1 = arith.constant 0 : index
    %c0_2 = arith.constant 0 : index
    %1 = vector.load %arg2[%c0_1, %c0_2] : memref<128x128xf32, #tpu.memory_space<vmem>>, vector<128x128xf32>
    %cst = arith.constant dense<0.000000e+00> : vector<8x128xf32>
    %2 = tpu.matmul %0, %1, %cst {dimension_numbers = #tpu.dot_dimension_numbers<[1], [0], [0], [1], [0, 0, 1, 1], [], []>} : vector<8x128xf32>, vector<128x128xf32>, vector<8x128xf32> -> vector<8x128xf32>
    %cst_3 = arith.constant 0.000000e+00 : f32
    %3 = vector.broadcast %cst_3 : f32 to vector<8x128xf32>
    %4 = arith.maximumf %2, %3 : vector<8x128xf32>
    %c0_4 = arith.constant 0 : index
    %c0_5 = arith.constant 0 : index
    %5 = vector.load %arg3[%c0_4, %c0_5] : memref<128x128xf32, #tpu.memory_space<vmem>>, vector<128x128xf32>
    %cst_6 = arith.constant dense<0.000000e+00> : vector<8x128xf32>
    %6 = tpu.matmul %4, %5, %cst_6 {dimension_numbers = #tpu.dot_dimension_numbers<[1], [0], [0], [1], [0, 0, 1, 1], [], []>} : vector<8x128xf32>, vector<128x128xf32>, vector<8x128xf32> -> vector<8x128xf32>
    %cst_7 = arith.constant 0.000000e+00 : f32
    %7 = vector.broadcast %cst_7 : f32 to vector<8x128xf32>
    %8 = arith.maximumf %6, %7 : vector<8x128xf32>
    %c0_8 = arith.constant 0 : index
    %c0_9 = arith.constant 0 : index
    %9 = vector.load %arg4[%c0_8, %c0_9] : memref<128x128xf32, #tpu.memory_space<vmem>>, vector<128x128xf32>
    %cst_10 = arith.constant dense<0.000000e+00> : vector<8x128xf32>
    %10 = tpu.matmul %8, %9, %cst_10 {dimension_numbers = #tpu.dot_dimension_numbers<[1], [0], [0], [1], [0, 0, 1, 1], [], []>} : vector<8x128xf32>, vector<128x128xf32>, vector<8x128xf32> -> vector<8x128xf32>
    %11 = math.tanh %10 : vector<8x128xf32>
    %c0_11 = arith.constant 0 : index
    %c0_12 = arith.constant 0 : index
    %12 = vector.load %arg5[%c0_11, %c0_12] : memref<8x128xf32, #tpu.memory_space<vmem>>, vector<8x128xf32>
    tpu.vector_store %arg5[%c0_11, %c0_12], %11 {strides = array<i32>} : memref<8x128xf32, #tpu.memory_space<vmem>>, vector<8x128xf32>,
    return
  }
  func.func @transform_0(%arg0: i32) -> (i32, i32) {
    %c0_i32 = arith.constant 0 : i32
    %c0_i32_0 = arith.constant 0 : i32
    return %arg0, %c0_i32 : i32, i32
  }
  func.func @transform_1(%arg0: i32) -> (i32, i32) {
    %c0_i32 = arith.constant 0 : i32
    %c0_i32_0 = arith.constant 0 : i32
    %c0_i32_1 = arith.constant 0 : i32
    return %c0_i32, %c0_i32_0 : i32, i32
  }
  func.func @transform_2(%arg0: i32) -> (i32, i32) {
    %c0_i32 = arith.constant 0 : i32
    %c0_i32_0 = arith.constant 0 : i32
    %c0_i32_1 = arith.constant 0 : i32
    return %c0_i32, %c0_i32_0 : i32, i32
  }
  func.func @transform_3(%arg0: i32) -> (i32, i32) {
    %c0_i32 = arith.constant 0 : i32
    %c0_i32_0 = arith.constant 0 : i32
    %c0_i32_1 = arith.constant 0 : i32
    return %c0_i32, %c0_i32_0 : i32, i32
  }
  func.func @transform_4(%arg0: i32) -> (i32, i32) {
    %c0_i32 = arith.constant 0 : i32
    %c0_i32_0 = arith.constant 0 : i32
    return %arg0, %c0_i32 : i32, i32
  }
}

</mosaic_0001>

<bundles_post_ra>
// kernel: actor_forward.1
= control target key start
LH: loop header
LB: loop body
LE: loop exit
PB: predicated region body
PF: predicated region fallthrough
CT: control target
= control target key end

     0   :  { %9 = vsyncpa [#allocation3], 0  ;;  %s802_s0 = inlined_call_operand.vmem [shape: f32[8,128], index: 0, kind: input, shape index: {}]   ;;  %s803_s1 = inlined_call_operand.hbm [shape: f32[128,128], index: 1, kind: input, shape index: {}]   ;;  %s804_s2 = inlined_call_operand.hbm [shape: f32[128,128], index: 2, kind: input, shape index: {}]   ;;  %s805_s3 = inlined_call_operand.hbm [shape: f32[128,128], index: 3, kind: input, shape index: {}]   ;;  %s806_s4 = inlined_call_operand.hbm [shape: f32[8,128], index: 4, kind: output, shape index: {}]  }
   0x1   :  { %10 = vsyncpa [#allocation6], 0 }
   0x2   :  { %11 = vsyncpa [#allocation4], 0  ;;  %s671_s15 = smov [#allocation5]   ;;  %s672_s17 = smov [#allocation2]  }
   0x3   :  { %s31_s16 = sshll.u32 %s671_s15, 4  ;;  %s19_s18 = sshll.u32 %s672_s17, 4  ;;  %s32_s16 = int_to_ptr.vmem [resolvable:$true] %s31_s16  ;;  %s705_s18 = int_to_ptr.vmem [resolvable:$true] %s19_s18 }
   0x4   :  { %s577_s21 = scalar_lea.hbm %s804_s2, 2048 }
   0x5   :  { %p578_p0 = scmp.ne.s32.totalorder %s804_s2, %s577_s21  ;;  %p581_p1 = scmp.lt.u32.totalorder %s577_s21, %s804_s2 }
   0x7   :  { %p583_p2 = pnand %p581_p1, %p578_p0 }
   0x9   :  { %586 = shalt.err (!%p583_p2)
}
   0xa   :  { %s587_s26 = scalar_lea.vmem %s32_s16, 2048  ;;  %p592_p4 = scmp.lt.s32.totalorder %s32_s16, %s32_s16 }
   0xb   :  { %p588_p3 = scmp.ne.s32.totalorder %s32_s16, %s587_s26  ;;  %p593_p5 = scmp.lt.s32.totalorder %s587_s26, %s587_s26 }
   0xd   :  { %p594_p6 = por %p593_p5, %p592_p4 }
   0xf   :  { %p595_p7 = pnand %p594_p6, %p588_p3 }
  0x11   :  { %598 = shalt.err (!%p595_p7)
}
  0x12   :  { %s673_s27 = smov 128   ;;  %s674_s28 = smov 8  }
  0x13   :  { %37 = dma.hbm_to_vmem [thread:$0]  %s804_s2, 2048, %s32_s16, [#allocation6], %s673_s27, %s673_s27, %s674_s28  }
  0x14   :  { %s599_s7 = scalar_lea.hbm %s803_s1, 2048 }
  0x15   :  { %p600_p8 = scmp.ne.s32.totalorder %s803_s1, %s599_s7  ;;  %p603_p9 = scmp.lt.u32.totalorder %s599_s7, %s803_s1 }
  0x17   :  { %p605_p10 = pnand %p603_p9, %p600_p8 }
  0x19   :  { %608 = shalt.err (!%p605_p10)
}
  0x1a   :  { %s609_s12 = scalar_lea.vmem %s705_s18, 2048  ;;  %p614_p12 = scmp.lt.s32.totalorder %s705_s18, %s705_s18 }
  0x1b   :  { %p610_p11 = scmp.ne.s32.totalorder %s705_s18, %s609_s12  ;;  %p615_p13 = scmp.lt.s32.totalorder %s609_s12, %s609_s12 }
  0x1d   :  { %p616_p0 = por %p615_p13, %p614_p12 }
  0x1f   :  { %p617_p1 = pnand %p616_p0, %p610_p11 }
  0x21   :  { %620 = shalt.err (!%p617_p1)
}
  0x22   :  { %25 = dma.hbm_to_vmem [thread:$0]  %s803_s1, 2048, %s705_s18, [#allocation3], %s673_s27, %s673_s27, %s674_s28  }
  0x23   :  { %s675_s14 = smov [#allocation7]   ;;  %s621_s19 = scalar_lea.hbm %s805_s3, 2048 }
  0x24   :  { %s43_s15 = sshll.u32 %s675_s14, 4  ;;  %p622_p2 = scmp.ne.s32.totalorder %s805_s3, %s621_s19  ;;  %s44_s15 = int_to_ptr.vmem [resolvable:$true] %s43_s15 }
  0x25   :  { %p625_p3 = scmp.lt.u32.totalorder %s621_s19, %s805_s3 }
  0x27   :  { %p627_p4 = pnand %p625_p3, %p622_p2 }
  0x29   :  { %630 = shalt.err (!%p627_p4)
}
  0x2a   :  { %s631_s24 = scalar_lea.vmem %s44_s15, 2048  ;;  %p636_p6 = scmp.lt.s32.totalorder %s44_s15, %s44_s15 }
  0x2b   :  { %p632_p5 = scmp.ne.s32.totalorder %s44_s15, %s631_s24  ;;  %p637_p7 = scmp.lt.s32.totalorder %s631_s24, %s631_s24 }
  0x2d   :  { %p638_p8 = por %p637_p7, %p636_p6 }
  0x2f   :  { %p639_p9 = pnand %p638_p8, %p632_p5 }
  0x31   :  { %642 = shalt.err (!%p639_p9)
}
  0x32   :  { %49 = dma.hbm_to_vmem [thread:$0]  %s805_s3, 2048, %s44_s15, [#allocation6], %s673_s27, %s673_s27, %s674_s28  }
  0x33   :  { %665 = dma.done.wait [#allocation3], 2048  }
  0x34   :  { %666 = vsyncadd [#allocation3], 4294965248 }
  0x35   :  { %667 = dma.done.wait [#allocation6], 4096  }
  0x36   :  { %668 = vsyncadd [#allocation6], 4294963200  ;;  %v676_v0 = vmov 0.0|0.0   ;;  %vm677_vm0 = vmmov 0   ;;  %v678_v1 = vmov 0.0   ;;  %v60_v2 = vld [vmem:[#allocation2] sm:$0xff] }
  0x37   :  { %494 = vmatprep.subr.bf16.mxu0 %v676_v0  ;;  %421 = vmatprep.mubr.msk.f32.mxu0 %vm677_vm0, %v678_v1  ;;  %v61_v3 = vld [vmem:[#allocation2 + $0x8] sm:$0xff]  ;;  %v62_v4 = vld [vmem:[#allocation2 + $0x10] sm:$0xff]  ;;  %v63_v6 = vld [vmem:[#allocation2 + $0x18] sm:$0xff] }
  0x38   :  { %518 = vmatprep.subr.bf16.mxu1 %v676_v0  ;;  %456 = vmatprep.mubr.msk.f32.mxu1 %vm677_vm0, %v678_v1  ;;  %v495_v5 = vpack.c.bf16 %v61_v3, %v60_v2  ;;  %v498_v7 = vpack.c.bf16 %v63_v6, %v62_v4  ;;  %v64_v8 = vld [vmem:[#allocation2 + $0x20] sm:$0xff]  ;;  %v65_v9 = vld [vmem:[#allocation2 + $0x28] sm:$0xff]  ;;  %v149_v12 = vld [vmem:[#allocation5 + $0x10] sm:$0xff] }
  0x39   :  { %v147_v10 = vld [vmem:[#allocation5] sm:$0xff]  ;;  %v148_v11 = vld [vmem:[#allocation5 + $0x8] sm:$0xff]  ;;  %v150_v13 = vld [vmem:[#allocation5 + $0x18] sm:$0xff]  ;;  %v501_v14 = vpack.c.bf16 %v65_v9, %v64_v8 }
  0x3a   :  { %496 = vmatpush3.bf16.msra.mxu0 %v495_v5  ;;  %v519_v15 = vpack.c.bf16 %v148_v11, %v147_v10  ;;  %v66_v16 = vld [vmem:[#allocation2 + $0x30] sm:$0xff]  ;;  %v67_v17 = vld [vmem:[#allocation2 + $0x38] sm:$0xff]  ;;  %v522_v18 = vpack.c.bf16 %v150_v13, %v149_v12  ;;  %v151_v19 = vld [vmem:[#allocation5 + $0x20] sm:$0xff] }
  0x3b   :  { %497 = vmatprep.subr.bf16.mxu0 %v676_v0  ;;  %v152_v20 = vld [vmem:[#allocation5 + $0x28] sm:$0xff]  ;;  %v504_v21 = vpack.c.bf16 %v67_v17, %v66_v16  ;;  %v68_v22 = vld [vmem:[#allocation2 + $0x40] sm:$0xff]  ;;  %v153_v25 = vld [vmem:[#allocation5 + $0x30] sm:$0xff] }
  0x3c   :  { %520 = vmatpush3.bf16.msra.mxu1 %v519_v15  ;;  %v69_v23 = vld [vmem:[#allocation2 + $0x48] sm:$0xff]  ;;  %v525_v24 = vpack.c.bf16 %v152_v20, %v151_v19  ;;  %v154_v26 = vld [vmem:[#allocation5 + $0x38] sm:$0xff]  ;;  %v70_v28 = vld [vmem:[#allocation2 + $0x50] sm:$0xff] }
  0x3d   :  { %521 = vmatprep.subr.bf16.mxu1 %v676_v0  ;;  %v507_v27 = vpack.c.bf16 %v69_v23, %v68_v22  ;;  %v71_v29 = vld [vmem:[#allocation2 + $0x58] sm:$0xff]  ;;  %v528_v30 = vpack.c.bf16 %v154_v26, %v153_v25  ;;  %v155_v31 = vld [vmem:[#allocation5 + $0x40] sm:$0xff]  ;;  %v156_v32 = vld [vmem:[#allocation5 + $0x48] sm:$0xff] }
  0x3e   :  { %499 = vmatpush3.bf16.msra.mxu0 %v498_v7  ;;  %v510_v33 = vpack.c.bf16 %v71_v29, %v70_v28  ;;  %v72_v34 = vld [vmem:[#allocation2 + $0x60] sm:$0xff]  ;;  %v73_v35 = vld [vmem:[#allocation2 + $0x68] sm:$0xff]  ;;  %v531_v36 = vpack.c.bf16 %v156_v32, %v155_v31  ;;  %v157_v37 = vld [vmem:[#allocation5 + $0x50] sm:$0xff] }
  0x3f   :  { %500 = vmatprep.subr.bf16.mxu0 %v676_v0  ;;  %v158_v38 = vld [vmem:[#allocation5 + $0x58] sm:$0xff]  ;;  %v513_v39 = vpack.c.bf16 %v73_v35, %v72_v34  ;;  %v74_v40 = vld [vmem:[#allocation2 + $0x70] sm:$0xff]  ;;  %v159_v43 = vld [vmem:[#allocation5 + $0x60] sm:$0xff] }
  0x40   :  { %523 = vmatpush3.bf16.msra.mxu1 %v522_v18  ;;  %v75_v41 = vld [vmem:[#allocation2 + $0x78] sm:$0xff]  ;;  %v534_v42 = vpack.c.bf16 %v158_v38, %v157_v37  ;;  %v160_v44 = vld [vmem:[#allocation5 + $0x68] sm:$0xff]  ;;  %v59_v47 = vld [vmem:[%s802_s0] sm:$0xff]  ;;  %s679_s0 = smov [#allocation8]  }
  0x41   :  { %524 = vmatprep.subr.bf16.mxu1 %v676_v0  ;;  %v516_v45 = vpack.c.bf16 %v75_v41, %v74_v40  ;;  %v537_v46 = vpack.c.bf16 %v160_v44, %v159_v43  ;;  %v161_v48 = vld [vmem:[#allocation5 + $0x70] sm:$0xff]  ;;  %v162_v49 = vld [vmem:[#allocation5 + $0x78] sm:$0xff]  ;;  %v234_v51 = vld [vmem:[#allocation7] sm:$0xff]  ;;  %s328_s26 = sshll.u32 %s679_s0, 4  ;;  %s329_s26 = int_to_ptr.vmem [resolvable:$true] %s328_s26 }
  0x42   :  { %502 = vmatpush3.bf16.msra.mxu0 %v501_v14  ;;  %v540_v50 = vpack.c.bf16 %v162_v49, %v161_v48  ;;  %v235_v52 = vld [vmem:[#allocation7 + $0x8] sm:$0xff]  ;;  %v236_v53 = vld [vmem:[#allocation7 + $0x10] sm:$0xff]  ;;  %v237_v55 = vld [vmem:[#allocation7 + $0x18] sm:$0xff]  ;;  %s643_s27 = scalar_lea.vmem %s329_s26, 128  ;;  %p648_p11 = scmp.lt.s32.totalorder %s329_s26, %s329_s26 }
  0x43   :  { %503 = vmatprep.subr.bf16.mxu0 %v676_v0  ;;  %v543_v54 = vpack.c.bf16 %v235_v52, %v234_v51  ;;  %v546_v56 = vpack.c.bf16 %v237_v55, %v236_v53  ;;  %v238_v57 = vld [vmem:[#allocation7 + $0x20] sm:$0xff]  ;;  %v239_v58 = vld [vmem:[#allocation7 + $0x28] sm:$0xff]  ;;  %v240_v60 = vld [vmem:[#allocation7 + $0x30] sm:$0xff]  ;;  %p644_p10 = scmp.ne.s32.totalorder %s329_s26, %s643_s27  ;;  %p649_p12 = scmp.lt.s32.totalorder %s643_s27, %s643_s27 }
  0x44   :  { %526 = vmatpush3.bf16.msra.mxu1 %v525_v24  ;;  %v549_v59 = vpack.c.bf16 %v239_v58, %v238_v57  ;;  %v241_v61 = vld [vmem:[#allocation7 + $0x38] sm:$0xff]  ;;  %v242_v63 = vld [vmem:[#allocation7 + $0x40] sm:$0xff]  ;;  %v244_v3 = vld [vmem:[#allocation7 + $0x50] sm:$0xff] }
  0x45   :  { %527 = vmatprep.subr.bf16.mxu1 %v676_v0  ;;  %v552_v62 = vpack.c.bf16 %v241_v61, %v240_v60  ;;  %v245_v4 = vld [vmem:[#allocation7 + $0x58] sm:$0xff]  ;;  %v246_v6 = vld [vmem:[#allocation7 + $0x60] sm:$0xff]  ;;  %v247_v7 = vld [vmem:[#allocation7 + $0x68] sm:$0xff]  ;;  %p650_p13 = por %p649_p12, %p648_p11 }
  0x46   :  { %505 = vmatpush3.bf16.msra.mxu0 %v504_v21  ;;  %v558_v5 = vpack.c.bf16 %v245_v4, %v244_v3  ;;  %v561_v8 = vpack.c.bf16 %v247_v7, %v246_v6  ;;  %v248_v12 = vld [vmem:[#allocation7 + $0x70] sm:$0xff]  ;;  %v249_v13 = vld [vmem:[#allocation7 + $0x78] sm:$0xff] }
  0x47   :  { %506 = vmatprep.subr.bf16.mxu0 %v676_v0  ;;  %v564_v14 = vpack.c.bf16 %v249_v13, %v248_v12  ;;  %p651_p0 = pnand %p650_p13, %p644_p10 }
  0x48   :  { %529 = vmatpush3.bf16.msra.mxu1 %v528_v30 }
  0x49   :  { %530 = vmatprep.subr.bf16.mxu1 %v676_v0 }
  0x4a   :  { %508 = vmatpush3.bf16.msra.mxu0 %v507_v27 }
  0x4b   :  { %509 = vmatprep.subr.bf16.mxu0 %v676_v0 }
  0x4c   :  { %532 = vmatpush3.bf16.msra.mxu1 %v531_v36 }
  0x4d   :  { %533 = vmatprep.subr.bf16.mxu1 %v676_v0 }
  0x4e   :  { %511 = vmatpush3.bf16.msra.mxu0 %v510_v33 }
  0x4f   :  { %512 = vmatprep.subr.bf16.mxu0 %v676_v0 }
  0x50   :  { %535 = vmatpush3.bf16.msra.mxu1 %v534_v42 }
  0x51   :  { %536 = vmatprep.subr.bf16.mxu1 %v676_v0 }
  0x52   :  { %514 = vmatpush3.bf16.msra.mxu0 %v513_v39 }
  0x53   :  { %515 = vmatprep.subr.bf16.mxu0 %v676_v0 }
  0x54   :  { %538 = vmatpush3.bf16.msra.mxu1 %v537_v46 }
  0x55   :  { %539 = vmatprep.subr.bf16.mxu1 %v676_v0 }
  0x56   :  { %517 = vmatpush3.bf16.msra.mxu0 %v516_v45 }
  0x57   :  { %542 = vmatprep.subr.bf16.mxu0 %v676_v0 }
  0x58   :  { %541 = vmatpush3.bf16.msra.mxu1 %v540_v50 }
  0x59   :  { %422 = vmatmul.mubr.f32.vlgmr.msra.gmra.mrb[0].mxu0 %v59_v47 }
  0x5a   :  { %491 = vmatprep.mubr.msk.f32.mxu0 %vm677_vm0, %v678_v1  ;;  %544 = vmatpush3.bf16.msra.mxu0 %v543_v54  ;;  %v243_v1 = vld [vmem:[#allocation7 + $0x48] sm:$0xff] }
  0x5b   :  { %545 = vmatprep.subr.bf16.mxu0 %v676_v0  ;;  %v555_v2 = vpack.c.bf16 %v243_v1, %v242_v63 }
  0x5e   :  { %547 = vmatpush3.bf16.msra.mxu0 %v546_v56 }
  0x5f   :  { %548 = vmatprep.subr.bf16.mxu0 %v676_v0 }
  0x62   :  { %550 = vmatpush3.bf16.msra.mxu0 %v549_v59 }
  0x63   :  { %551 = vmatprep.subr.bf16.mxu0 %v676_v0 }
  0x66   :  { %553 = vmatpush3.bf16.msra.mxu0 %v552_v62 }
  0x67   :  { %554 = vmatprep.subr.bf16.mxu0 %v676_v0 }
  0x6a   :  { %556 = vmatpush3.bf16.msra.mxu0 %v555_v2 }
  0x6b   :  { %557 = vmatprep.subr.bf16.mxu0 %v676_v0 }
  0x6e   :  { %559 = vmatpush3.bf16.msra.mxu0 %v558_v5 }
  0x6f   :  { %560 = vmatprep.subr.bf16.mxu0 %v676_v0 }
  0x72   :  { %562 = vmatpush3.bf16.msra.mxu0 %v561_v8 }
  0x73   :  { %563 = vmatprep.subr.bf16.mxu0 %v676_v0 }
  0x76   :  { %565 = vmatpush3.bf16.msra.mxu0 %v564_v14 }
 0x12c   :  { %v142_v9 = vpop.f32.mrb[0].mxu0 }
 0x12d   :  { %v146_v10 = vmax.f32 %v142_v9, 0.0  ;;  %v423_v11 = vpop.f32.mrb[1].mxu0 }
 0x12f   :  { %457 = vmatmul.mubr.f32.vlgmr.msra.gmra.mrb[0].mxu1 %v146_v10 }
 0x202   :  { %v229_v15 = vpop.f32.mrb[0].mxu1 }
 0x203   :  { %v233_v16 = vmax.f32 %v229_v15, 0.0  ;;  %v458_v17 = vpop.f32.mrb[1].mxu1 }
 0x205   :  { %492 = vmatmul.mubr.f32.vlgmr.msra.gmra.mrb[2].mxu0 %v233_v16 }
 0x2d8   :  { %v316_v18 = vpop.f32.mrb[2].mxu0 }
 0x2d9   :  { %575 = vtanh.f32 %v316_v18  ;;  %v493_v19 = vpop.f32.mrb[3].mxu0 }
 0x2e3   :  { %v576_v20 = vpop.eup %575 }
 0x2e4   :  { %321 = vst [vmem:[#allocation8] sm:$0xff] %v576_v20 }
 0x2e5   :  { %654 = shalt.err (!%p651_p0)
}
 0x2e6   :  { %s655_s30 = scalar_lea.hbm %s806_s4, 128 }
 0x2e7   :  { %p656_p1 = scmp.ne.s32.totalorder %s806_s4, %s655_s30  ;;  %p659_p2 = scmp.lt.u32.totalorder %s655_s30, %s806_s4 }
 0x2e9   :  { %p661_p3 = pnand %p659_p2, %p656_p1 }
 0x2eb   :  { %664 = shalt.err (!%p661_p3)
}
 0x2ec   :  { %331 = dma.vmem_to_hbm [thread:$0]  %s329_s26, 128, %s806_s4, [#allocation4]  }
 0x2ed   :  { %669 = dma.done.wait [#allocation4], 128  }
 0x2ee   :  { %670 = vsyncadd [#allocation4], 4294967168 }
 0x2ef   :  { %335 = vsyncpa [#allocation3], 1 }
 0x2f0   :  { %336 = vsyncpa [#allocation6], 1 }
 0x2f1   :  { %337 = vsyncpa [#allocation4], 1 }

</bundles_post_ra>
